<compile_context>
chip_gen: v7x
topology: tpu7x:2x2x1
jax: 0.10.0
libtpu: 0.0.40
codegen_flags: <defaults>
</compile_context>

<pallas_src>
import jax
import jax.numpy as jnp
from jax.experimental import pallas as pl
from jax.experimental.pallas import tpu as pltpu

PAD_ID = 0  # index of '<pad>' in the vocab


def _round_up(x, m):
    return (x + m - 1) // m * m


def _nlp_kernel(tok_ref, w1e_ref, b1_ref, w2_ref, b2_ref, w3_ref, b3_ref, out_ref):
    # tok_ref: (TB, S) int32 batch-major token ids for this batch tile
    # w1e_ref: (V, H) fused (emb * 1/S) @ W1 with the pad row zeroed (param dtype)
    # b1/b2:   (1, H) f32;  w2: (H, H);  w3: (H, Op);  b3: (1, Op) f32
    # out_ref: (TB, Op) f32 lane-dense (padded) logits
    V = w1e_ref.shape[0]

    tok = tok_ref[...]                                               # (TB, S) int32

    # Token counts per batch row, lane-dense on V.  The iota is a (1, 1, V) constant
    # broadcast by the compare; the bool result is reduced straight to int32.
    iota_v = jax.lax.broadcasted_iota(jnp.int32, (1, 1, V), 2)
    counts = jnp.sum(tok[:, :, None] == iota_v, axis=1, dtype=jnp.int32)   # (TB, V)
    # counts <= S, so this cast (bf16 or f32) is exact.  1/S and the pad-row zeroing
    # ("embedded * mask" in the module) are already folded into w1e, so pad tokens
    # multiply a zero row and contribute nothing.
    counts_c = counts.astype(w1e_ref.dtype)

    # Fused (embedding-sum + layer-1) matmul, then layers 2 and 3.
    # MXU accumulation in f32; biases added and ReLU applied in f32.
    h1 = jnp.maximum(
        jnp.dot(counts_c, w1e_ref[...], preferred_element_type=jnp.float32)
        + b1_ref[...], 0.0)                                          # (TB, H) f32
    h2 = jnp.maximum(
        jnp.dot(h1.astype(w2_ref.dtype), w2_ref[...],
                preferred_element_type=jnp.float32) + b2_ref[...], 0.0)
    out_ref[...] = (
        jnp.dot(h2.astype(w3_ref.dtype), w3_ref[...],
                preferred_element_type=jnp.float32) + b3_ref[...])   # (TB, Op) f32


def nlp_model_forward(tokens, emb, w1, b1, w2, b2, w3, b3, *,
                      pad_id=PAD_ID, batch_tile=None, param_dtype=jnp.bfloat16):
    """tokens: (S, B) int32, seq-major like the PyTorch module.
    Weights are pre-transposed to (in, out) so layers compute x @ W + b.
    Returns (B, output_dim) float32 logits."""
    S, B = tokens.shape
    V, E = emb.shape
    H = w1.shape[1]
    O = w3.shape[1]

    # ---- one-time weight prep (cache next to the params in a real deployment) -----
    # Zero the pad row (== the "* mask" in the module), fold the pad-inclusive 1/S
    # mean and the embedding lookup into layer 1:  h1 = relu(counts @ W1e + b1).
    emb_z = emb.at[pad_id, :].set(0.0)
    w1e = ((emb_z * (1.0 / float(S))) @ w1).astype(param_dtype)      # (V, H)
    Op = _round_up(O, 128)                                           # lane-dense logits slab
    w2c = w2.astype(param_dtype)
    w3c = jnp.pad(w3, ((0, 0), (0, Op - O))).astype(param_dtype)
    b1r = b1.reshape(1, -1).astype(jnp.float32)
    b2r = b2.reshape(1, -1).astype(jnp.float32)
    b3r = jnp.pad(b3, ((0, Op - O),)).reshape(1, -1).astype(jnp.float32)

    # ---- batch-major tokens + batch tiling -----------------------------------------
    tok_bm = tokens.T.astype(jnp.int32)                              # (B, S)
    if batch_tile is None:
        Bp8 = _round_up(max(B, 1), 8)
        if Bp8 <= 8:
            batch_tile = Bp8              # one tiny tile; nothing worth splitting
        else:
            # >=2 grid steps so both v7x TensorCores get work; on 1-TC chips the grid
            # is a serial loop and two large tiles still amortize per-step overhead,
            # while dividing the padded batch tightly (no nearly-all-pad tile).
            batch_tile = min(512, _round_up((Bp8 + 1) // 2, 8))
    Bp = _round_up(B, batch_tile)
    if Bp != B:
        tok_bm = jnp.pad(tok_bm, ((0, Bp - B), (0, 0)), constant_values=pad_id)

    # ---- VMEM budget: single-buffered resident weights + pipelined I/O tiles -------
    bpe = jnp.dtype(param_dtype).itemsize
    resident = (V * H + H * H + H * Op) * bpe + (2 * H + Op) * 4     # weights + f32 biases
    io_tiles = 2 * batch_tile * (S * 4 + Op * 4)                     # double-buffered in/out
    hot = batch_tile * (S * V + V + 2 * H + Op) * 4                  # one-hot + activations
    vmem_limit = min(48 * 1024 * 1024,                               # v7x headroom (64 MiB phys)
                     max(32 * 1024 * 1024, int(1.5 * (resident + io_tiles + hot))))

    const = lambda i: (0, 0)                                         # weights stay VMEM-resident

    def build(single_buffer_weights):
        if single_buffer_weights:
            # Constant-index blocks are fetched once; no need to double-buffer them.
            wspec = lambda shp: pl.BlockSpec(shp, const, pipeline_mode=pl.Buffered(1))
        else:
            wspec = lambda shp: pl.BlockSpec(shp, const)
        return pl.pallas_call(
            _nlp_kernel,
            out_shape=jax.ShapeDtypeStruct((Bp, Op), jnp.float32),
            grid=(Bp // batch_tile,),
            in_specs=[
                pl.BlockSpec((batch_tile, S), lambda i: (i, 0)),     # tokens (batch tiles)
                wspec((V, H)),                                       # fused W1e
                wspec((1, H)),                                       # b1
                wspec((H, H)),                                       # w2
                wspec((1, H)),                                       # b2
                wspec((H, Op)),                                      # w3 (lane-padded)
                wspec((1, Op)),                                      # b3 (lane-padded)
            ],
            out_specs=pl.BlockSpec((batch_tile, Op), lambda i: (i, 0)),
            compiler_params=pltpu.CompilerParams(
                dimension_semantics=("parallel",),                   # megacore batch split
                vmem_limit_bytes=vmem_limit,
            ),
        )

    args = (tok_bm, w1e, b1r, w2c, b2r, w3c, b3r)
    try:
        out_padded = build(single_buffer_weights=True)(*args)
    except Exception:
        # Fallback if this JAX/Mosaic build rejects pl.Buffered(1) at pallas_call level.
        out_padded = build(single_buffer_weights=False)(*args)

    return out_padded[:B, :O]


def _reference_forward(tokens, emb, w1, b1, w2, b2, w3, b3, *, pad_id=PAD_ID):
    embedded = emb[tokens]                                           # (S, B, E)
    mask = (tokens != pad_id)[:, :, None].astype(jnp.float32)
    embedded = embedded * mask
    pooled = embedded.mean(axis=0)                                   # (B, E)
    h1 = jax.nn.relu(pooled @ w1 + b1)
    h2 = jax.nn.relu(h1 @ w2 + b2)
    return h2 @ w3 + b3


if __name__ == "__main__":
    # Small, module-consistent shapes.
    V = 32          # vocab size (index 0 == '<pad>')
    E = 16          # embedding_dim
    H = 32          # hidden_dim
    O = 4           # output_dim
    S = 8           # sequence length (fixed-length tokenized string)
    B = 2           # batch size

    key = jax.random.PRNGKey(0)
    k_tok, k_emb, k_w1, k_b1, k_w2, k_b2, k_w3, k_b3 = jax.random.split(key, 8)

    # Deterministic synthetic parameters (torch.nn.Linear stored as (out,in);
    # here kept pre-transposed as (in,out) for x @ W).
    emb = jax.random.normal(k_emb, (V, E), jnp.float32) * 0.1
    w1 = jax.random.normal(k_w1, (E, H), jnp.float32) * 0.1
    b1 = jax.random.normal(k_b1, (H,), jnp.float32) * 0.1
    w2 = jax.random.normal(k_w2, (H, H), jnp.float32) * 0.1
    b2 = jax.random.normal(k_b2, (H,), jnp.float32) * 0.1
    w3 = jax.random.normal(k_w3, (H, O), jnp.float32) * 0.1
    b3 = jax.random.normal(k_b3, (O,), jnp.float32) * 0.1

    # Token ids in [1, V); sprinkle explicit pads at the tail.
    tokens = jax.random.randint(k_tok, (S, B), 1, V, dtype=jnp.int32)
    tokens = tokens.at[-2:, :].set(PAD_ID)

    ref = _reference_forward(tokens, emb, w1, b1, w2, b2, w3, b3)

    # f32-parameter path: exact forward semantics of the module (tight tolerance; the
    # emb@W1 / 1/S pre-fusion only reorders f32 summation).
    out_f32 = jax.block_until_ready(
        nlp_model_forward(tokens, emb, w1, b1, w2, b2, w3, b3,
                          param_dtype=jnp.float32))
    assert out_f32.shape == (B, O)
    assert jnp.allclose(out_f32, ref, atol=1e-5, rtol=1e-4)

    # Default bf16-parameter path (native MXU input dtype); tolerance covers only the
    # bf16 weight quantization — accumulation, biases and activations stay f32.
    out_bf16 = jax.block_until_ready(
        nlp_model_forward(tokens, emb, w1, b1, w2, b2, w3, b3))
    assert out_bf16.shape == (B, O)
    assert jnp.allclose(out_bf16, ref, atol=1e-2, rtol=1e-2)

    print("KERNEL_OK")
</pallas_src>

<mosaic_0001>
module attributes {stable_mosaic.version = 11 : i64} {
  func.func @_nlp_kernel(%arg0: i32, %arg1: memref<8x8xi32, #tpu.memory_space<vmem>>, %arg2: memref<32x32xf32, #tpu.memory_space<vmem>>, %arg3: memref<1x32xf32, #tpu.memory_space<vmem>>, %arg4: memref<32x32xf32, #tpu.memory_space<vmem>>, %arg5: memref<1x32xf32, #tpu.memory_space<vmem>>, %arg6: memref<32x128xf32, #tpu.memory_space<vmem>>, %arg7: memref<1x128xf32, #tpu.memory_space<vmem>>, %arg8: memref<8x128xf32, #tpu.memory_space<vmem>>) attributes {dimension_semantics = [#tpu.dimension_semantics<parallel>], iteration_bounds = array<i64: 1>, scalar_prefetch = 0 : i64, scratch_operands = 0 : i64, tpu.core_type = #tpu.core_type<tc>, window_params = [{transform_indices = @transform_0, window_bounds = array<i64: 8, 8>}, {pipeline_mode = #tpu.pipeline_mode<synchronous>, transform_indices = @transform_1, window_bounds = array<i64: 32, 32>}, {pipeline_mode = #tpu.pipeline_mode<synchronous>, transform_indices = @transform_2, window_bounds = array<i64: 1, 32>}, {pipeline_mode = #tpu.pipeline_mode<synchronous>, transform_indices = @transform_3, window_bounds = array<i64: 32, 32>}, {pipeline_mode = #tpu.pipeline_mode<synchronous>, transform_indices = @transform_4, window_bounds = array<i64: 1, 32>}, {pipeline_mode = #tpu.pipeline_mode<synchronous>, transform_indices = @transform_5, window_bounds = array<i64: 32, 128>}, {pipeline_mode = #tpu.pipeline_mode<synchronous>, transform_indices = @transform_6, window_bounds = array<i64: 1, 128>}, {transform_indices = @transform_7, window_bounds = array<i64: 8, 128>}]} {
    %c0 = arith.constant 0 : index
    %c0_0 = arith.constant 0 : index
    %0 = vector.load %arg1[%c0, %c0_0] : memref<8x8xi32, #tpu.memory_space<vmem>>, vector<8x8xi32>
    %1 = tpu.iota {dimensions = array<i32: 2>} : vector<1x1x32xi32>
    %2 = vector.shape_cast %0 : vector<8x8xi32> to vector<8x8x1xi32>
    %3 = vector.broadcast %2 : vector<8x8x1xi32> to vector<8x8x32xi32>
    %4 = vector.broadcast %1 : vector<1x1x32xi32> to vector<8x8x32xi32>
    %5 = arith.cmpi eq, %3, %4 : vector<8x8x32xi32>
    %6 = arith.extui %5 : vector<8x8x32xi1> to vector<8x8x32xi32>
    %cst = arith.constant dense<0> : vector<8x32xi32>
    %7 = vector.multi_reduction <add>, %6, %cst [1] : vector<8x8x32xi32> to vector<8x32xi32>
    %8 = arith.sitofp %7 : vector<8x32xi32> to vector<8x32xf32>
    %c0_1 = arith.constant 0 : index
    %c0_2 = arith.constant 0 : index
    %9 = vector.load %arg2[%c0_1, %c0_2] : memref<32x32xf32, #tpu.memory_space<vmem>>, vector<32x32xf32>
    %cst_3 = arith.constant dense<0.000000e+00> : vector<8x32xf32>
    %10 = tpu.matmul %8, %9, %cst_3 {dimension_numbers = #tpu.dot_dimension_numbers<[1], [0], [0], [1], [0, 0, 1, 1], [], []>} : vector<8x32xf32>, vector<32x32xf32>, vector<8x32xf32> -> vector<8x32xf32>
    %c0_4 = arith.constant 0 : index
    %c0_5 = arith.constant 0 : index
    %11 = vector.load %arg3[%c0_4, %c0_5] : memref<1x32xf32, #tpu.memory_space<vmem>>, vector<1x32xf32>
    %12 = vector.broadcast %11 : vector<1x32xf32> to vector<8x32xf32>
    %13 = arith.addf %10, %12 : vector<8x32xf32>
    %cst_6 = arith.constant 0.000000e+00 : f32
    %14 = vector.broadcast %cst_6 : f32 to vector<8x32xf32>
    %15 = arith.maximumf %13, %14 : vector<8x32xf32>
    %c0_7 = arith.constant 0 : index
    %c0_8 = arith.constant 0 : index
    %16 = vector.load %arg4[%c0_7, %c0_8] : memref<32x32xf32, #tpu.memory_space<vmem>>, vector<32x32xf32>
    %cst_9 = arith.constant dense<0.000000e+00> : vector<8x32xf32>
    %17 = tpu.matmul %15, %16, %cst_9 {dimension_numbers = #tpu.dot_dimension_numbers<[1], [0], [0], [1], [0, 0, 1, 1], [], []>} : vector<8x32xf32>, vector<32x32xf32>, vector<8x32xf32> -> vector<8x32xf32>
    %c0_10 = arith.constant 0 : index
    %c0_11 = arith.constant 0 : index
    %18 = vector.load %arg5[%c0_10, %c0_11] : memref<1x32xf32, #tpu.memory_space<vmem>>, vector<1x32xf32>
    %19 = vector.broadcast %18 : vector<1x32xf32> to vector<8x32xf32>
    %20 = arith.addf %17, %19 : vector<8x32xf32>
    %cst_12 = arith.constant 0.000000e+00 : f32
    %21 = vector.broadcast %cst_12 : f32 to vector<8x32xf32>
    %22 = arith.maximumf %20, %21 : vector<8x32xf32>
    %c0_13 = arith.constant 0 : index
    %c0_14 = arith.constant 0 : index
    %23 = vector.load %arg6[%c0_13, %c0_14] : memref<32x128xf32, #tpu.memory_space<vmem>>, vector<32x128xf32>
    %cst_15 = arith.constant dense<0.000000e+00> : vector<8x128xf32>
    %24 = tpu.matmul %22, %23, %cst_15 {dimension_numbers = #tpu.dot_dimension_numbers<[1], [0], [0], [1], [0, 0, 1, 1], [], []>} : vector<8x32xf32>, vector<32x128xf32>, vector<8x128xf32> -> vector<8x128xf32>
    %c0_16 = arith.constant 0 : index
    %c0_17 = arith.constant 0 : index
    %25 = vector.load %arg7[%c0_16, %c0_17] : memref<1x128xf32, #tpu.memory_space<vmem>>, vector<1x128xf32>
    %26 = vector.broadcast %25 : vector<1x128xf32> to vector<8x128xf32>
    %27 = arith.addf %24, %26 : vector<8x128xf32>
    %c0_18 = arith.constant 0 : index
    %c0_19 = arith.constant 0 : index
    %28 = vector.load %arg8[%c0_18, %c0_19] : memref<8x128xf32, #tpu.memory_space<vmem>>, vector<8x128xf32>
    tpu.vector_store %arg8[%c0_18, %c0_19], %27 {strides = array<i32>} : memref<8x128xf32, #tpu.memory_space<vmem>>, vector<8x128xf32>,
    return
  }
  func.func @transform_0(%arg0: i32) -> (i32, i32) {
    %c0_i32 = arith.constant 0 : i32
    %c0_i32_0 = arith.constant 0 : i32
    return %arg0, %c0_i32 : i32, i32
  }
  func.func @transform_1(%arg0: i32) -> (i32, i32) {
    %c0_i32 = arith.constant 0 : i32
    %c0_i32_0 = arith.constant 0 : i32
    %c0_i32_1 = arith.constant 0 : i32
    return %c0_i32, %c0_i32_0 : i32, i32
  }
  func.func @transform_2(%arg0: i32) -> (i32, i32) {
    %c0_i32 = arith.constant 0 : i32
    %c0_i32_0 = arith.constant 0 : i32
    %c0_i32_1 = arith.constant 0 : i32
    return %c0_i32, %c0_i32_0 : i32, i32
  }
  func.func @transform_3(%arg0: i32) -> (i32, i32) {
    %c0_i32 = arith.constant 0 : i32
    %c0_i32_0 = arith.constant 0 : i32
    %c0_i32_1 = arith.constant 0 : i32
    return %c0_i32, %c0_i32_0 : i32, i32
  }
  func.func @transform_4(%arg0: i32) -> (i32, i32) {
    %c0_i32 = arith.constant 0 : i32
    %c0_i32_0 = arith.constant 0 : i32
    %c0_i32_1 = arith.constant 0 : i32
    return %c0_i32, %c0_i32_0 : i32, i32
  }
  func.func @transform_5(%arg0: i32) -> (i32, i32) {
    %c0_i32 = arith.constant 0 : i32
    %c0_i32_0 = arith.constant 0 : i32
    %c0_i32_1 = arith.constant 0 : i32
    return %c0_i32, %c0_i32_0 : i32, i32
  }
  func.func @transform_6(%arg0: i32) -> (i32, i32) {
    %c0_i32 = arith.constant 0 : i32
    %c0_i32_0 = arith.constant 0 : i32
    %c0_i32_1 = arith.constant 0 : i32
    return %c0_i32, %c0_i32_0 : i32, i32
  }
  func.func @transform_7(%arg0: i32) -> (i32, i32) {
    %c0_i32 = arith.constant 0 : i32
    %c0_i32_0 = arith.constant 0 : i32
    return %arg0, %c0_i32 : i32, i32
  }
}

module attributes {stable_mosaic.version = 11 : i64} {
  func.func @_nlp_kernel(%arg0: i32, %arg1: memref<8x8xi32, #tpu.memory_space<vmem>>, %arg2: memref<32x32xf32, #tpu.memory_space<vmem>>, %arg3: memref<1x32xf32, #tpu.memory_space<vmem>>, %arg4: memref<32x32xf32, #tpu.memory_space<vmem>>, %arg5: memref<1x32xf32, #tpu.memory_space<vmem>>, %arg6: memref<32x128xf32, #tpu.memory_space<vmem>>, %arg7: memref<1x128xf32, #tpu.memory_space<vmem>>, %arg8: memref<8x128xf32, #tpu.memory_space<vmem>>) attributes {dimension_semantics = [#tpu.dimension_semantics<parallel>], iteration_bounds = array<i64: 1>, scalar_prefetch = 0 : i64, scratch_operands = 0 : i64, tpu.core_type = #tpu.core_type<tc>, window_params = [{transform_indices = @transform_0, window_bounds = array<i64: 8, 8>}, {pipeline_mode = #tpu.pipeline_mode<synchronous>, transform_indices = @transform_1, window_bounds = array<i64: 32, 32>}, {pipeline_mode = #tpu.pipeline_mode<synchronous>, transform_indices = @transform_2, window_bounds = array<i64: 1, 32>}, {pipeline_mode = #tpu.pipeline_mode<synchronous>, transform_indices = @transform_3, window_bounds = array<i64: 32, 32>}, {pipeline_mode = #tpu.pipeline_mode<synchronous>, transform_indices = @transform_4, window_bounds = array<i64: 1, 32>}, {pipeline_mode = #tpu.pipeline_mode<synchronous>, transform_indices = @transform_5, window_bounds = array<i64: 32, 128>}, {pipeline_mode = #tpu.pipeline_mode<synchronous>, transform_indices = @transform_6, window_bounds = array<i64: 1, 128>}, {transform_indices = @transform_7, window_bounds = array<i64: 8, 128>}]} {
    %c0 = arith.constant 0 : index
    %c0_0 = arith.constant 0 : index
    %0 = vector.load %arg1[%c0, %c0_0] : memref<8x8xi32, #tpu.memory_space<vmem>>, vector<8x8xi32>
    %1 = tpu.iota {dimensions = array<i32: 2>} : vector<1x1x32xi32>
    %2 = vector.shape_cast %0 : vector<8x8xi32> to vector<8x8x1xi32>
    %3 = vector.broadcast %2 : vector<8x8x1xi32> to vector<8x8x32xi32>
    %4 = vector.broadcast %1 : vector<1x1x32xi32> to vector<8x8x32xi32>
    %5 = arith.cmpi eq, %3, %4 : vector<8x8x32xi32>
    %6 = arith.extui %5 : vector<8x8x32xi1> to vector<8x8x32xi32>
    %cst = arith.constant dense<0> : vector<8x32xi32>
    %7 = vector.multi_reduction <add>, %6, %cst [1] : vector<8x8x32xi32> to vector<8x32xi32>
    %8 = arith.sitofp %7 : vector<8x32xi32> to vector<8x32xf32>
    %c0_1 = arith.constant 0 : index
    %c0_2 = arith.constant 0 : index
    %9 = vector.load %arg2[%c0_1, %c0_2] : memref<32x32xf32, #tpu.memory_space<vmem>>, vector<32x32xf32>
    %cst_3 = arith.constant dense<0.000000e+00> : vector<8x32xf32>
    %10 = tpu.matmul %8, %9, %cst_3 {dimension_numbers = #tpu.dot_dimension_numbers<[1], [0], [0], [1], [0, 0, 1, 1], [], []>} : vector<8x32xf32>, vector<32x32xf32>, vector<8x32xf32> -> vector<8x32xf32>
    %c0_4 = arith.constant 0 : index
    %c0_5 = arith.constant 0 : index
    %11 = vector.load %arg3[%c0_4, %c0_5] : memref<1x32xf32, #tpu.memory_space<vmem>>, vector<1x32xf32>
    %12 = vector.broadcast %11 : vector<1x32xf32> to vector<8x32xf32>
    %13 = arith.addf %10, %12 : vector<8x32xf32>
    %cst_6 = arith.constant 0.000000e+00 : f32
    %14 = vector.broadcast %cst_6 : f32 to vector<8x32xf32>
    %15 = arith.maximumf %13, %14 : vector<8x32xf32>
    %c0_7 = arith.constant 0 : index
    %c0_8 = arith.constant 0 : index
    %16 = vector.load %arg4[%c0_7, %c0_8] : memref<32x32xf32, #tpu.memory_space<vmem>>, vector<32x32xf32>
    %cst_9 = arith.constant dense<0.000000e+00> : vector<8x32xf32>
    %17 = tpu.matmul %15, %16, %cst_9 {dimension_numbers = #tpu.dot_dimension_numbers<[1], [0], [0], [1], [0, 0, 1, 1], [], []>} : vector<8x32xf32>, vector<32x32xf32>, vector<8x32xf32> -> vector<8x32xf32>
    %c0_10 = arith.constant 0 : index
    %c0_11 = arith.constant 0 : index
    %18 = vector.load %arg5[%c0_10, %c0_11] : memref<1x32xf32, #tpu.memory_space<vmem>>, vector<1x32xf32>
    %19 = vector.broadcast %18 : vector<1x32xf32> to vector<8x32xf32>
    %20 = arith.addf %17, %19 : vector<8x32xf32>
    %cst_12 = arith.constant 0.000000e+00 : f32
    %21 = vector.broadcast %cst_12 : f32 to vector<8x32xf32>
    %22 = arith.maximumf %20, %21 : vector<8x32xf32>
    %c0_13 = arith.constant 0 : index
    %c0_14 = arith.constant 0 : index
    %23 = vector.load %arg6[%c0_13, %c0_14] : memref<32x128xf32, #tpu.memory_space<vmem>>, vector<32x128xf32>
    %cst_15 = arith.constant dense<0.000000e+00> : vector<8x128xf32>
    %24 = tpu.matmul %22, %23, %cst_15 {dimension_numbers = #tpu.dot_dimension_numbers<[1], [0], [0], [1], [0, 0, 1, 1], [], []>} : vector<8x32xf32>, vector<32x128xf32>, vector<8x128xf32> -> vector<8x128xf32>
    %c0_16 = arith.constant 0 : index
    %c0_17 = arith.constant 0 : index
    %25 = vector.load %arg7[%c0_16, %c0_17] : memref<1x128xf32, #tpu.memory_space<vmem>>, vector<1x128xf32>
    %26 = vector.broadcast %25 : vector<1x128xf32> to vector<8x128xf32>
    %27 = arith.addf %24, %26 : vector<8x128xf32>
    %c0_18 = arith.constant 0 : index
    %c0_19 = arith.constant 0 : index
    %28 = vector.load %arg8[%c0_18, %c0_19] : memref<8x128xf32, #tpu.memory_space<vmem>>, vector<8x128xf32>
    tpu.vector_store %arg8[%c0_18, %c0_19], %27 {strides = array<i32>} : memref<8x128xf32, #tpu.memory_space<vmem>>, vector<8x128xf32>,
    return
  }
  func.func @transform_0(%arg0: i32) -> (i32, i32) {
    %c0_i32 = arith.constant 0 : i32
    %c0_i32_0 = arith.constant 0 : i32
    return %arg0, %c0_i32 : i32, i32
  }
  func.func @transform_1(%arg0: i32) -> (i32, i32) {
    %c0_i32 = arith.constant 0 : i32
    %c0_i32_0 = arith.constant 0 : i32
    %c0_i32_1 = arith.constant 0 : i32
    return %c0_i32, %c0_i32_0 : i32, i32
  }
  func.func @transform_2(%arg0: i32) -> (i32, i32) {
    %c0_i32 = arith.constant 0 : i32
    %c0_i32_0 = arith.constant 0 : i32
    %c0_i32_1 = arith.constant 0 : i32
    return %c0_i32, %c0_i32_0 : i32, i32
  }
  func.func @transform_3(%arg0: i32) -> (i32, i32) {
    %c0_i32 = arith.constant 0 : i32
    %c0_i32_0 = arith.constant 0 : i32
    %c0_i32_1 = arith.constant 0 : i32
    return %c0_i32, %c0_i32_0 : i32, i32
  }
  func.func @transform_4(%arg0: i32) -> (i32, i32) {
    %c0_i32 = arith.constant 0 : i32
    %c0_i32_0 = arith.constant 0 : i32
    %c0_i32_1 = arith.constant 0 : i32
    return %c0_i32, %c0_i32_0 : i32, i32
  }
  func.func @transform_5(%arg0: i32) -> (i32, i32) {
    %c0_i32 = arith.constant 0 : i32
    %c0_i32_0 = arith.constant 0 : i32
    %c0_i32_1 = arith.constant 0 : i32
    return %c0_i32, %c0_i32_0 : i32, i32
  }
  func.func @transform_6(%arg0: i32) -> (i32, i32) {
    %c0_i32 = arith.constant 0 : i32
    %c0_i32_0 = arith.constant 0 : i32
    %c0_i32_1 = arith.constant 0 : i32
    return %c0_i32, %c0_i32_0 : i32, i32
  }
  func.func @transform_7(%arg0: i32) -> (i32, i32) {
    %c0_i32 = arith.constant 0 : i32
    %c0_i32_0 = arith.constant 0 : i32
    return %arg0, %c0_i32 : i32, i32
  }
}

</mosaic_0001>

<bundles_post_ra>
// kernel: tpu_custom_call.1
= control target key start
LH: loop header
LB: loop body
LE: loop exit
PB: predicated region body
PF: predicated region fallthrough
CT: control target
= control target key end

     0   :  { %12 = vsyncpa [#allocation3], 0  ;;  %s866_s0 = inlined_call_operand.hbm [shape: s32[8,8], index: 0, kind: input, shape index: {}]   ;;  %s867_s1 = inlined_call_operand.hbm [shape: f32[32,32], index: 1, kind: input, shape index: {}]   ;;  %s868_s2 = inlined_call_operand.vmem [shape: f32[1,32], index: 2, kind: input, shape index: {}]   ;;  %s869_s3 = inlined_call_operand.hbm [shape: f32[32,32], index: 3, kind: input, shape index: {}]   ;;  %s870_s4 = inlined_call_operand.vmem [shape: f32[1,32], index: 4, kind: input, shape index: {}]   ;;  %s871_s5 = inlined_call_operand.hbm [shape: f32[32,128], index: 5, kind: input, shape index: {}]   ;;  %s872_s6 = inlined_call_operand.vmem [shape: f32[1,128], index: 6, kind: input, shape index: {}]   ;;  %s873_s7 = inlined_call_operand.hbm [shape: f32[8,128], index: 7, kind: output, shape index: {}]  }
   0x1   :  { %13 = vsyncpa [#allocation6], 0 }
   0x2   :  { %14 = vsyncpa [#allocation9], 0 }
   0x3   :  { %15 = vsyncpa [#allocation4], 0  ;;  %s714_s24 = smov [#allocation5]   ;;  %s596_s28 = scalar_lea.hbm %s867_s1, 512 }
   0x4   :  { %s31_s25 = sshll.u32 %s714_s24, 4  ;;  %p597_p0 = scmp.ne.s32.totalorder %s867_s1, %s596_s28  ;;  %s32_s25 = int_to_ptr.vmem [resolvable:$true] %s31_s25 }
   0x5   :  { %p600_p1 = scmp.lt.u32.totalorder %s596_s28, %s867_s1 }
   0x7   :  { %p602_p2 = pnand %p600_p1, %p597_p0 }
   0x9   :  { %605 = shalt.err (!%p602_p2)
}
   0xa   :  { %s606_s10 = scalar_lea.vmem %s32_s25, 512  ;;  %p611_p4 = scmp.lt.s32.totalorder %s32_s25, %s32_s25 }
   0xb   :  { %p607_p3 = scmp.ne.s32.totalorder %s32_s25, %s606_s10  ;;  %p612_p5 = scmp.lt.s32.totalorder %s606_s10, %s606_s10 }
   0xd   :  { %p613_p6 = por %p612_p5, %p611_p4 }
   0xf   :  { %p614_p7 = pnand %p613_p6, %p607_p3 }
  0x11   :  { %617 = shalt.err (!%p614_p7)
}
  0x12   :  { %s715_s11 = smov 128   ;;  %s716_s12 = smov 8  }
  0x13   :  { %37 = dma.hbm_to_vmem [thread:$0]  %s867_s1, 512, %s32_s25, [#allocation6], %s715_s11, %s715_s11, %s716_s12  }
  0x14   :  { %s717_s15 = smov [#allocation2]   ;;  %s718_s17 = smov [#allocation7]  }
  0x15   :  { %s22_s16 = sshll.u32 %s717_s15, 4  ;;  %s45_s18 = sshll.u32 %s718_s17, 4  ;;  %s23_s16 = int_to_ptr.vmem [resolvable:$true] %s22_s16  ;;  %s46_s18 = int_to_ptr.vmem [resolvable:$true] %s45_s18 }
  0x16   :  { %s618_s21 = scalar_lea.hbm %s866_s0, 128 }
  0x17   :  { %p619_p8 = scmp.ne.s32.totalorder %s866_s0, %s618_s21  ;;  %p622_p9 = scmp.lt.u32.totalorder %s618_s21, %s866_s0 }
  0x19   :  { %p624_p10 = pnand %p622_p9, %p619_p8 }
  0x1b   :  { %627 = shalt.err (!%p624_p10)
}
  0x1c   :  { %s628_s1 = scalar_lea.vmem %s23_s16, 128  ;;  %p633_p12 = scmp.lt.s32.totalorder %s23_s16, %s23_s16 }
  0x1d   :  { %p629_p11 = scmp.ne.s32.totalorder %s23_s16, %s628_s1  ;;  %p634_p13 = scmp.lt.s32.totalorder %s628_s1, %s628_s1 }
  0x1f   :  { %p635_p0 = por %p634_p13, %p633_p12 }
  0x21   :  { %p636_p1 = pnand %p635_p0, %p629_p11 }
  0x23   :  { %639 = shalt.err (!%p636_p1)
}
  0x24   :  { %25 = dma.hbm_to_vmem [thread:$0]  %s866_s0, 128, %s23_s16, [#allocation3]  }
  0x25   :  { %s640_s30 = scalar_lea.hbm %s869_s3, 512 }
  0x26   :  { %p641_p2 = scmp.ne.s32.totalorder %s869_s3, %s640_s30  ;;  %p644_p3 = scmp.lt.u32.totalorder %s640_s30, %s869_s3 }
  0x28   :  { %p646_p4 = pnand %p644_p3, %p641_p2 }
  0x2a   :  { %649 = shalt.err (!%p646_p4)
}
  0x2b   :  { %s650_s14 = scalar_lea.vmem %s46_s18, 512  ;;  %p655_p6 = scmp.lt.s32.totalorder %s46_s18, %s46_s18 }
  0x2c   :  { %p651_p5 = scmp.ne.s32.totalorder %s46_s18, %s650_s14  ;;  %p656_p7 = scmp.lt.s32.totalorder %s650_s14, %s650_s14 }
  0x2e   :  { %p657_p8 = por %p656_p7, %p655_p6 }
  0x30   :  { %p658_p9 = pnand %p657_p8, %p651_p5 }
  0x32   :  { %661 = shalt.err (!%p658_p9)
}
  0x33   :  { %51 = dma.hbm_to_vmem [thread:$0]  %s869_s3, 512, %s46_s18, [#allocation6], %s715_s11, %s715_s11, %s716_s12  }
  0x34   :  { %s719_s16 = smov [#allocation8]   ;;  %s662_s21 = scalar_lea.hbm %s871_s5, 512 }
  0x35   :  { %s59_s17 = sshll.u32 %s719_s16, 4  ;;  %p663_p10 = scmp.ne.s32.totalorder %s871_s5, %s662_s21  ;;  %s60_s17 = int_to_ptr.vmem [resolvable:$true] %s59_s17 }
  0x36   :  { %p666_p11 = scmp.lt.u32.totalorder %s662_s21, %s871_s5 }
  0x38   :  { %p668_p12 = pnand %p666_p11, %p663_p10 }
  0x3a   :  { %671 = shalt.err (!%p668_p12)
}
  0x3b   :  { %s672_s1 = scalar_lea.vmem %s60_s17, 512  ;;  %p677_p0 = scmp.lt.s32.totalorder %s60_s17, %s60_s17 }
  0x3c   :  { %p673_p13 = scmp.ne.s32.totalorder %s60_s17, %s672_s1  ;;  %p678_p1 = scmp.lt.s32.totalorder %s672_s1, %s672_s1 }
  0x3e   :  { %p679_p2 = por %p678_p1, %p677_p0 }
  0x40   :  { %p680_p3 = pnand %p679_p2, %p673_p13 }
  0x42   :  { %683 = shalt.err (!%p680_p3)
}
  0x43   :  { %65 = dma.hbm_to_vmem [thread:$0]  %s871_s5, 512, %s60_s17, [#allocation9], %s715_s11, %s715_s11, %s716_s12  }
  0x44   :  { %706 = dma.done.wait [#allocation3], 128  }
  0x45   :  { %707 = vsyncadd [#allocation3], 4294967168 }
  0x46   :  { %708 = dma.done.wait [#allocation6], 1024  }
  0x47   :  { %709 = vsyncadd [#allocation6], 4294966272 }
  0x48   :  { %710 = dma.done.wait [#allocation9], 512  }
  0x49   :  { %711 = vsyncadd [#allocation9], 4294966784  ;;  %v81_v0 = vlaneseq  ;;  %v80_v6 = vld [vmem:[#allocation2] sm:$0xff]  ;;  %v220_v19 = vld [vmem:[#allocation5] sm:$0xff]  ;;  %v720_v22 = vmov 0.0|0.0   ;;  %vm721_vm0 = vmmov 0  }
  0x4a   :  { %v221_v20 = vld [vmem:[#allocation5 + $0x8] sm:$0xff]  ;;  %567 = vmatprep.subr.bf16.mxu0 %v720_v22  ;;  %573 = vmatprep.subr.bf16.mxu1 %v720_v22  ;;  %v222_v23 = vld [vmem:[#allocation5 + $0x10] sm:$0xff]  ;;  %v223_v24 = vld [vmem:[#allocation5 + $0x18] sm:$0xff]  ;;  %v722_v26 = vmov 0.0   ;;  %vm155_vm1 = vcmask 261120   ;;  %v723_v33 = vmov 0  }
  0x4b   :  { %v84_v1 = vshrl.u32 %v81_v0, 7  ;;  %v568_v21 = vpack.c.bf16 %v221_v20, %v220_v19  ;;  %v571_v25 = vpack.c.bf16 %v223_v24, %v222_v23  ;;  %542 = vmatprep.mubr.msk.f32.mxu0 %vm721_vm0, %v722_v26  ;;  %553 = vmatprep.mubr.msk.f32.mxu1 %vm721_vm0, %v722_v26  ;;  %v326_v27 = vld [vmem:[#allocation7] sm:$0xff]  ;;  %v327_v28 = vld [vmem:[#allocation7 + $0x8] sm:$0xff]  ;;  %v82_v30 = vand.u32 127, %v81_v0  ;;  %s724_s28 = smov [#allocation10]  }
  0x4c   :  { %v574_v29 = vpack.c.bf16 %v327_v28, %v326_v27  ;;  %vm239_vm10 = vcmask 1041409   ;;  %vm241_vm11 = vcmask 1042434   ;;  %vm243_vm12 = vcmask 1043459   ;;  %s502_s29 = sshll.u32 %s724_s28, 4  ;;  %s503_s29 = int_to_ptr.vmem [resolvable:$true] %s502_s29 }
  0x4d   :  { %v99_v2 = vsub.s32 2, %v84_v1  ;;  %v85_v3 = vsub.s32 0, %v84_v1  ;;  %v106_v4 = vsub.s32 3, %v84_v1  ;;  %v92_v5 = vsub.s32 1, %v84_v1  ;;  %569 = vmatpush3.bf16.msra.mxu0 %v568_v21  ;;  %s684_s30 = scalar_lea.vmem %s503_s29, 128  ;;  %p689_p5 = scmp.lt.s32.totalorder %s503_s29, %s503_s29 }
  0x4e   :  { %v120_v11 = vsub.s32 5, %v84_v1  ;;  %v113_v12 = vsub.s32 4, %v84_v1  ;;  %v134_v15 = vsub.s32 7, %v84_v1  ;;  %v127_v16 = vsub.s32 6, %v84_v1  ;;  %570 = vmatprep.subr.bf16.mxu0 %v720_v22  ;;  %575 = vmatpush3.bf16.msra.mxu1 %v574_v29  ;;  %p685_p4 = scmp.ne.s32.totalorder %s503_s29, %s684_s30  ;;  %p690_p6 = scmp.lt.s32.totalorder %s684_s30, %s684_s30 }
  0x4f   :  { %v100_v7 = vrot.slane %v80_v6, %v99_v2  ;;  %v86_v8 = vrot.slane %v80_v6, %v85_v3  ;;  %v107_v9 = vrot.slane %v80_v6, %v106_v4  ;;  %v93_v10 = vrot.slane %v80_v6, %v92_v5  ;;  %576 = vmatprep.subr.bf16.mxu1 %v720_v22 }
  0x50   :  { %v121_v13 = vrot.slane %v80_v6, %v120_v11  ;;  %v114_v14 = vrot.slane %v80_v6, %v113_v12  ;;  %v135_v17 = vrot.slane %v80_v6, %v134_v15  ;;  %v128_v18 = vrot.slane %v80_v6, %v127_v16  ;;  %p691_p7 = por %p690_p6, %p689_p5 }
  0x51   :  { %102 = vbcast.lane.b32.xlu1 %v100_v7, 256  ;;  %88 = vbcast.lane.b32.xlu0 %v86_v8, 256  ;;  %vm245_vm13 = vcmask 1044484   ;;  %vm247_vm14 = vcmask 1045509   ;;  %vm249_vm15 = vcmask 1046534  }
  0x52   :  { %572 = vmatpush3.bf16.msra.mxu0 %v571_v25  ;;  %p692_p8 = pnand %p691_p7, %p685_p4 }
  0x53   :  { %579 = vmatprep.subr.bf16.mxu0 %v720_v22 }
  0x55   :  { %109 = vbcast.lane.b32.xlu1 %v107_v9, 256  ;;  %95 = vbcast.lane.b32.xlu0 %v93_v10, 256 }
  0x59   :  { %123 = vbcast.lane.b32.xlu1 %v121_v13, 256  ;;  %116 = vbcast.lane.b32.xlu0 %v114_v14, 256 }
  0x5d   :  { %137 = vbcast.lane.b32.xlu1 %v135_v17, 256  ;;  %130 = vbcast.lane.b32.xlu0 %v128_v18, 256 }
  0xc3   :  { %v103_v31 = vpop.permute.xlu1 %102  ;;  %v89_v32 = vpop.permute.xlu0 %88 }
  0xc4   :  { %vm141_vm2 = vcmp.eq.s32.totalorder %v103_v31, %v82_v30  ;;  %vm139_vm3 = vcmp.eq.s32.totalorder %v89_v32, %v82_v30 }
  0xc5   :  { %v149_v34 = vsel %vm141_vm2, 1, %v723_v33  ;;  %v147_v35 = vsel %vm139_vm3, 1, %v723_v33  ;;  %vm251_vm2 = vcmask 1047559  }
  0xc6   :  { %v170_v36 = vsel %vm155_vm1, %v149_v34, 0  ;;  %v156_v37 = vsel %vm155_vm1, %v147_v35, 0 }
  0xc7   :  { %v171_v38 = vrot.slane %v170_v36, 4  ;;  %v157_v39 = vrot.slane %v156_v37, 4  ;;  %v110_v40 = vpop.permute.xlu1 %109  ;;  %v96_v41 = vpop.permute.xlu0 %95 }
  0xc8   :  { %vm142_vm4 = vcmp.eq.s32.totalorder %v110_v40, %v82_v30  ;;  %vm140_vm5 = vcmp.eq.s32.totalorder %v96_v41, %v82_v30 }
  0xc9   :  { %v172_v42 = vadd.s32 %v171_v38, %v170_v36  ;;  %v158_v43 = vadd.s32 %v157_v39, %v156_v37  ;;  %v150_v44 = vsel %vm142_vm4, 1, %v723_v33  ;;  %v148_v45 = vsel %vm140_vm5, 1, %v723_v33 }
  0xca   :  { %v177_v46 = vsel %vm155_vm1, %v150_v44, 0  ;;  %v163_v47 = vsel %vm155_vm1, %v148_v45, 0 }
  0xcb   :  { %v173_v48 = vrot.slane %v172_v42, 2  ;;  %v159_v49 = vrot.slane %v158_v43, 2  ;;  %v178_v50 = vrot.slane %v177_v46, 4  ;;  %v164_v51 = vrot.slane %v163_v47, 4  ;;  %v124_v52 = vpop.permute.xlu1 %123  ;;  %v117_v53 = vpop.permute.xlu0 %116 }
  0xcc   :  { %vm144_vm6 = vcmp.eq.s32.totalorder %v124_v52, %v82_v30  ;;  %vm143_vm7 = vcmp.eq.s32.totalorder %v117_v53, %v82_v30 }
  0xcd   :  { %v174_v54 = vadd.s32 %v173_v48, %v172_v42  ;;  %v160_v55 = vadd.s32 %v159_v49, %v158_v43  ;;  %v179_v56 = vadd.s32 %v178_v50, %v177_v46  ;;  %v165_v57 = vadd.s32 %v164_v51, %v163_v47 }
  0xce   :  { %v152_v58 = vsel %vm144_vm6, 1, %v723_v33  ;;  %v151_v59 = vsel %vm143_vm7, 1, %v723_v33 }
  0xcf   :  { %v175_v60 = vrot.slane %v174_v54, 1  ;;  %v161_v61 = vrot.slane %v160_v55, 1  ;;  %v180_v62 = vrot.slane %v179_v56, 2  ;;  %v166_v63 = vrot.slane %v165_v57, 2  ;;  %v138_v0 = vpop.permute.xlu1 %137  ;;  %v131_v1 = vpop.permute.xlu0 %130 }
  0xd0   :  { %v191_v2 = vsel %vm155_vm1, %v152_v58, 0  ;;  %v184_v3 = vsel %vm155_vm1, %v151_v59, 0  ;;  %vm146_vm8 = vcmp.eq.s32.totalorder %v138_v0, %v82_v30  ;;  %vm145_vm9 = vcmp.eq.s32.totalorder %v131_v1, %v82_v30  ;;  %v329_v58 = vld [vmem:[#allocation7 + $0x18] sm:$0xff] }
  0xd1   :  { %v162_v4 = vadd.s32 %v161_v61, %v160_v55  ;;  %v181_v5 = vadd.s32 %v180_v62, %v179_v56  ;;  %v167_v6 = vadd.s32 %v166_v63, %v165_v57  ;;  %v192_v7 = vrot.slane %v191_v2, 4  ;;  %v328_v57 = vld [vmem:[#allocation7 + $0x10] sm:$0xff]  ;;  %v412_v61 = vld [vmem:[#allocation8 + $0x8] sm:$0xff]  ;;  %v513_v63 = vld [vmem:[%s868_s2] ss:$0 sm:$0xff] }
  0xd2   :  { %v185_v8 = vrot.slane %v184_v3, 4  ;;  %v154_v9 = vsel %vm146_vm8, 1, %v723_v33  ;;  %v153_v10 = vsel %vm145_vm9, 1, %v723_v33  ;;  %v176_v11 = vadd.s32 %v175_v60, %v174_v54  ;;  %v411_v60 = vld [vmem:[#allocation8] sm:$0xff] }
  0xd3   :  { %v182_v12 = vrot.slane %v181_v5, 1  ;;  %v168_v13 = vrot.slane %v167_v6, 1  ;;  %v193_v14 = vadd.s32 %v192_v7, %v191_v2  ;;  %v205_v16 = vsel %vm155_vm1, %v154_v9, 0 }
  0xd4   :  { %v186_v15 = vadd.s32 %v185_v8, %v184_v3  ;;  %v198_v17 = vsel %vm155_vm1, %v153_v10, 0  ;;  %v206_v19 = vrot.slane %v205_v16, 4  ;;  %v212_v21 = vcvt.s32.f32 %v162_v4  ;;  %v414_v4 = vld [vmem:[#allocation8 + $0x18] sm:$0xff] }
  0xd5   :  { %v169_v18 = vadd.s32 %v168_v13, %v167_v6  ;;  %v199_v20 = vrot.slane %v198_v17, 4  ;;  %v194_v23 = vrot.slane %v193_v14, 2  ;;  %v183_v25 = vadd.s32 %v182_v12, %v181_v5  ;;  %v515_v6 = vld [vmem:[%s870_s4] ss:$0 sm:$0xff] }
  0xd6   :  { %v187_v24 = vrot.slane %v186_v15, 2  ;;  %v207_v28 = vadd.s32 %v206_v19, %v205_v16  ;;  %v214_v30 = vcvt.s32.f32 %v176_v11  ;;  %v577_v59 = vpack.c.bf16 %v329_v58, %v328_v57  ;;  %v517_v10 = vld [vmem:[%s872_s6] ss:$0 sm:$0xff] }
  0xd7   :  { %v213_v27 = vcvt.s32.f32 %v169_v18  ;;  %v200_v29 = vadd.s32 %v199_v20, %v198_v17  ;;  %v195_v31 = vadd.s32 %v194_v23, %v193_v14  ;;  %v215_v39 = vcvt.s32.f32 %v183_v25 }
  0xd8   :  { %v188_v32 = vadd.s32 %v187_v24, %v186_v15  ;;  %v208_v34 = vrot.slane %v207_v28, 2  ;;  %578 = vmatpush3.bf16.msra.mxu1 %v577_v59  ;;  %v580_v62 = vpack.c.bf16 %v412_v61, %v411_v60 }
  0xd9   :  { %v240_v33 = vsel %vm239_vm10, %v213_v27, %v212_v21  ;;  %v201_v35 = vrot.slane %v200_v29, 2  ;;  %v196_v36 = vrot.slane %v195_v31, 1 }
  0xda   :  { %v189_v37 = vrot.slane %v188_v32, 1  ;;  %v242_v38 = vsel %vm241_vm11, %v214_v30, %v240_v33  ;;  %v209_v40 = vadd.s32 %v208_v34, %v207_v28 }
  0xdb   :  { %v202_v41 = vadd.s32 %v201_v35, %v200_v29  ;;  %v197_v42 = vadd.s32 %v196_v36, %v195_v31  ;;  %v244_v46 = vsel %vm243_vm12, %v215_v39, %v242_v38 }
  0xdc   :  { %v190_v43 = vadd.s32 %v189_v37, %v188_v32  ;;  %v210_v44 = vrot.slane %v209_v40, 1 }
  0xdd   :  { %v203_v45 = vrot.slane %v202_v41, 1  ;;  %v217_v47 = vcvt.s32.f32 %v197_v42 }
  0xde   :  { %v216_v48 = vcvt.s32.f32 %v190_v43  ;;  %v211_v49 = vadd.s32 %v210_v44, %v209_v40 }
  0xdf   :  { %v204_v50 = vadd.s32 %v203_v45, %v202_v41 }
  0xe0   :  { %v246_v51 = vsel %vm245_vm13, %v216_v48, %v244_v46  ;;  %v219_v53 = vcvt.s32.f32 %v211_v49 }
  0xe1   :  { %v218_v52 = vcvt.s32.f32 %v204_v50  ;;  %v248_v54 = vsel %vm247_vm14, %v217_v47, %v246_v51 }
  0xe3   :  { %v250_v55 = vsel %vm249_vm15, %v218_v52, %v248_v54 }
  0xe4   :  { %v252_v56 = vsel %vm251_vm2, %v219_v53, %v250_v55 }
  0xe5   :  { %543 = vmatmul.mubr.msk.f32.vlgmr.msra.gmra.mrb[0].mxu0 %vm155_vm1, %v252_v56 }
  0xe6   :  { %564 = vmatprep.mubr.msk.f32.mxu0 %vm721_vm0, %v722_v26  ;;  %581 = vmatpush3.bf16.msra.mxu0 %v580_v62  ;;  %v413_v26 = vld [vmem:[#allocation8 + $0x10] sm:$0xff] }
  0xe7   :  { %582 = vmatprep.subr.bf16.mxu0 %v720_v22  ;;  %v583_v5 = vpack.c.bf16 %v414_v4, %v413_v26 }
  0xea   :  { %584 = vmatpush3.bf16.msra.mxu0 %v583_v5 }
 0x1b8   :  { %v321_v0 = vpop.f32.mrb[0].mxu0 }
 0x1b9   :  { %v322_v1 = vadd.f32 %v513_v63, %v321_v0  ;;  %v544_v2 = vpop.f32.mrb[1].mxu0 }
 0x1bb   :  { %v325_v3 = vmax.f32 %v322_v1, 0.0 }
 0x1bd   :  { %554 = vmatmul.mubr.msk.f32.vlgmr.msra.gmra.mrb[0].mxu1 %vm155_vm1, %v325_v3 }
 0x290   :  { %v406_v7 = vpop.f32.mrb[0].mxu1 }
 0x291   :  { %v407_v22 = vadd.f32 %v515_v6, %v406_v7  ;;  %v555_v8 = vpop.f32.mrb[1].mxu1 }
 0x293   :  { %v410_v9 = vmax.f32 %v407_v22, 0.0 }
 0x295   :  { %565 = vmatmul.mubr.msk.f32.vlgmr.msra.gmra.mrb[2].mxu0 %vm155_vm1, %v410_v9 }
 0x368   :  { %v491_v11 = vpop.f32.mrb[2].mxu0 }
 0x369   :  { %v492_v12 = vadd.f32 %v517_v10, %v491_v11  ;;  %v566_v13 = vpop.f32.mrb[3].mxu0 }
 0x36b   :  { %495 = vst [vmem:[#allocation10] sm:$0xff] %v492_v12 }
 0x36c   :  { %695 = shalt.err (!%p692_p8)
}
 0x36d   :  { %s696_s9 = scalar_lea.hbm %s873_s7, 128 }
 0x36e   :  { %p697_p9 = scmp.ne.s32.totalorder %s873_s7, %s696_s9  ;;  %p700_p10 = scmp.lt.u32.totalorder %s696_s9, %s873_s7 }
 0x370   :  { %p702_p11 = pnand %p700_p10, %p697_p9 }
 0x372   :  { %705 = shalt.err (!%p702_p11)
}
 0x373   :  { %505 = dma.vmem_to_hbm [thread:$0]  %s503_s29, 128, %s873_s7, [#allocation4]  }
 0x374   :  { %712 = dma.done.wait [#allocation4], 128  }
 0x375   :  { %713 = vsyncadd [#allocation4], 4294967168 }
 0x376   :  { %509 = vsyncpa [#allocation3], 1 }
 0x377   :  { %510 = vsyncpa [#allocation6], 1 }
 0x378   :  { %511 = vsyncpa [#allocation9], 1 }
 0x379   :  { %512 = vsyncpa [#allocation4], 1 }

// kernel: tpu_custom_call.1
= control target key start
LH: loop header
LB: loop body
LE: loop exit
PB: predicated region body
PF: predicated region fallthrough
CT: control target
= control target key end

     0   :  { %12 = vsyncpa [#allocation3], 0  ;;  %s866_s0 = inlined_call_operand.hbm [shape: s32[8,8], index: 0, kind: input, shape index: {}]   ;;  %s867_s1 = inlined_call_operand.hbm [shape: f32[32,32], index: 1, kind: input, shape index: {}]   ;;  %s868_s2 = inlined_call_operand.vmem [shape: f32[1,32], index: 2, kind: input, shape index: {}]   ;;  %s869_s3 = inlined_call_operand.hbm [shape: f32[32,32], index: 3, kind: input, shape index: {}]   ;;  %s870_s4 = inlined_call_operand.vmem [shape: f32[1,32], index: 4, kind: input, shape index: {}]   ;;  %s871_s5 = inlined_call_operand.hbm [shape: f32[32,128], index: 5, kind: input, shape index: {}]   ;;  %s872_s6 = inlined_call_operand.vmem [shape: f32[1,128], index: 6, kind: input, shape index: {}]   ;;  %s873_s7 = inlined_call_operand.hbm [shape: f32[8,128], index: 7, kind: output, shape index: {}]  }
   0x1   :  { %13 = vsyncpa [#allocation6], 0 }
   0x2   :  { %14 = vsyncpa [#allocation9], 0 }
   0x3   :  { %15 = vsyncpa [#allocation4], 0  ;;  %s714_s24 = smov [#allocation5]   ;;  %s596_s28 = scalar_lea.hbm %s867_s1, 512 }
   0x4   :  { %s31_s25 = sshll.u32 %s714_s24, 4  ;;  %p597_p0 = scmp.ne.s32.totalorder %s867_s1, %s596_s28  ;;  %s32_s25 = int_to_ptr.vmem [resolvable:$true] %s31_s25 }
   0x5   :  { %p600_p1 = scmp.lt.u32.totalorder %s596_s28, %s867_s1 }
   0x7   :  { %p602_p2 = pnand %p600_p1, %p597_p0 }
   0x9   :  { %605 = shalt.err (!%p602_p2)
}
   0xa   :  { %s606_s10 = scalar_lea.vmem %s32_s25, 512  ;;  %p611_p4 = scmp.lt.s32.totalorder %s32_s25, %s32_s25 }
   0xb   :  { %p607_p3 = scmp.ne.s32.totalorder %s32_s25, %s606_s10  ;;  %p612_p5 = scmp.lt.s32.totalorder %s606_s10, %s606_s10 }
   0xd   :  { %p613_p6 = por %p612_p5, %p611_p4 }
   0xf   :  { %p614_p7 = pnand %p613_p6, %p607_p3 }
  0x11   :  { %617 = shalt.err (!%p614_p7)
}
  0x12   :  { %s715_s11 = smov 128   ;;  %s716_s12 = smov 8  }
  0x13   :  { %37 = dma.hbm_to_vmem [thread:$0]  %s867_s1, 512, %s32_s25, [#allocation6], %s715_s11, %s715_s11, %s716_s12  }
  0x14   :  { %s717_s15 = smov [#allocation2]   ;;  %s718_s17 = smov [#allocation7]  }
  0x15   :  { %s22_s16 = sshll.u32 %s717_s15, 4  ;;  %s45_s18 = sshll.u32 %s718_s17, 4  ;;  %s23_s16 = int_to_ptr.vmem [resolvable:$true] %s22_s16  ;;  %s46_s18 = int_to_ptr.vmem [resolvable:$true] %s45_s18 }
  0x16   :  { %s618_s21 = scalar_lea.hbm %s866_s0, 128 }
  0x17   :  { %p619_p8 = scmp.ne.s32.totalorder %s866_s0, %s618_s21  ;;  %p622_p9 = scmp.lt.u32.totalorder %s618_s21, %s866_s0 }
  0x19   :  { %p624_p10 = pnand %p622_p9, %p619_p8 }
  0x1b   :  { %627 = shalt.err (!%p624_p10)
}
  0x1c   :  { %s628_s1 = scalar_lea.vmem %s23_s16, 128  ;;  %p633_p12 = scmp.lt.s32.totalorder %s23_s16, %s23_s16 }
  0x1d   :  { %p629_p11 = scmp.ne.s32.totalorder %s23_s16, %s628_s1  ;;  %p634_p13 = scmp.lt.s32.totalorder %s628_s1, %s628_s1 }
  0x1f   :  { %p635_p0 = por %p634_p13, %p633_p12 }
  0x21   :  { %p636_p1 = pnand %p635_p0, %p629_p11 }
  0x23   :  { %639 = shalt.err (!%p636_p1)
}
  0x24   :  { %25 = dma.hbm_to_vmem [thread:$0]  %s866_s0, 128, %s23_s16, [#allocation3]  }
  0x25   :  { %s640_s30 = scalar_lea.hbm %s869_s3, 512 }
  0x26   :  { %p641_p2 = scmp.ne.s32.totalorder %s869_s3, %s640_s30  ;;  %p644_p3 = scmp.lt.u32.totalorder %s640_s30, %s869_s3 }
  0x28   :  { %p646_p4 = pnand %p644_p3, %p641_p2 }
  0x2a   :  { %649 = shalt.err (!%p646_p4)
}
  0x2b   :  { %s650_s14 = scalar_lea.vmem %s46_s18, 512  ;;  %p655_p6 = scmp.lt.s32.totalorder %s46_s18, %s46_s18 }
  0x2c   :  { %p651_p5 = scmp.ne.s32.totalorder %s46_s18, %s650_s14  ;;  %p656_p7 = scmp.lt.s32.totalorder %s650_s14, %s650_s14 }
  0x2e   :  { %p657_p8 = por %p656_p7, %p655_p6 }
  0x30   :  { %p658_p9 = pnand %p657_p8, %p651_p5 }
  0x32   :  { %661 = shalt.err (!%p658_p9)
}
  0x33   :  { %51 = dma.hbm_to_vmem [thread:$0]  %s869_s3, 512, %s46_s18, [#allocation6], %s715_s11, %s715_s11, %s716_s12  }
  0x34   :  { %s719_s16 = smov [#allocation8]   ;;  %s662_s21 = scalar_lea.hbm %s871_s5, 512 }
  0x35   :  { %s59_s17 = sshll.u32 %s719_s16, 4  ;;  %p663_p10 = scmp.ne.s32.totalorder %s871_s5, %s662_s21  ;;  %s60_s17 = int_to_ptr.vmem [resolvable:$true] %s59_s17 }
  0x36   :  { %p666_p11 = scmp.lt.u32.totalorder %s662_s21, %s871_s5 }
  0x38   :  { %p668_p12 = pnand %p666_p11, %p663_p10 }
  0x3a   :  { %671 = shalt.err (!%p668_p12)
}
  0x3b   :  { %s672_s1 = scalar_lea.vmem %s60_s17, 512  ;;  %p677_p0 = scmp.lt.s32.totalorder %s60_s17, %s60_s17 }
  0x3c   :  { %p673_p13 = scmp.ne.s32.totalorder %s60_s17, %s672_s1  ;;  %p678_p1 = scmp.lt.s32.totalorder %s672_s1, %s672_s1 }
  0x3e   :  { %p679_p2 = por %p678_p1, %p677_p0 }
  0x40   :  { %p680_p3 = pnand %p679_p2, %p673_p13 }
  0x42   :  { %683 = shalt.err (!%p680_p3)
}
  0x43   :  { %65 = dma.hbm_to_vmem [thread:$0]  %s871_s5, 512, %s60_s17, [#allocation9], %s715_s11, %s715_s11, %s716_s12  }
  0x44   :  { %706 = dma.done.wait [#allocation3], 128  }
  0x45   :  { %707 = vsyncadd [#allocation3], 4294967168 }
  0x46   :  { %708 = dma.done.wait [#allocation6], 1024  }
  0x47   :  { %709 = vsyncadd [#allocation6], 4294966272 }
  0x48   :  { %710 = dma.done.wait [#allocation9], 512  }
  0x49   :  { %711 = vsyncadd [#allocation9], 4294966784  ;;  %v81_v0 = vlaneseq  ;;  %v80_v6 = vld [vmem:[#allocation2] sm:$0xff]  ;;  %v220_v19 = vld [vmem:[#allocation5] sm:$0xff]  ;;  %v720_v22 = vmov 0.0|0.0   ;;  %vm721_vm0 = vmmov 0  }
  0x4a   :  { %v221_v20 = vld [vmem:[#allocation5 + $0x8] sm:$0xff]  ;;  %567 = vmatprep.subr.bf16.mxu0 %v720_v22  ;;  %573 = vmatprep.subr.bf16.mxu1 %v720_v22  ;;  %v222_v23 = vld [vmem:[#allocation5 + $0x10] sm:$0xff]  ;;  %v223_v24 = vld [vmem:[#allocation5 + $0x18] sm:$0xff]  ;;  %v722_v26 = vmov 0.0   ;;  %vm155_vm1 = vcmask 261120   ;;  %v723_v33 = vmov 0  }
  0x4b   :  { %v84_v1 = vshrl.u32 %v81_v0, 7  ;;  %v568_v21 = vpack.c.bf16 %v221_v20, %v220_v19  ;;  %v571_v25 = vpack.c.bf16 %v223_v24, %v222_v23  ;;  %542 = vmatprep.mubr.msk.f32.mxu0 %vm721_vm0, %v722_v26  ;;  %553 = vmatprep.mubr.msk.f32.mxu1 %vm721_vm0, %v722_v26  ;;  %v326_v27 = vld [vmem:[#allocation7] sm:$0xff]  ;;  %v327_v28 = vld [vmem:[#allocation7 + $0x8] sm:$0xff]  ;;  %v82_v30 = vand.u32 127, %v81_v0  ;;  %s724_s28 = smov [#allocation10]  }
  0x4c   :  { %v574_v29 = vpack.c.bf16 %v327_v28, %v326_v27  ;;  %vm239_vm10 = vcmask 1041409   ;;  %vm241_vm11 = vcmask 1042434   ;;  %vm243_vm12 = vcmask 1043459   ;;  %s502_s29 = sshll.u32 %s724_s28, 4  ;;  %s503_s29 = int_to_ptr.vmem [resolvable:$true] %s502_s29 }
  0x4d   :  { %v99_v2 = vsub.s32 2, %v84_v1  ;;  %v85_v3 = vsub.s32 0, %v84_v1  ;;  %v106_v4 = vsub.s32 3, %v84_v1  ;;  %v92_v5 = vsub.s32 1, %v84_v1  ;;  %569 = vmatpush3.bf16.msra.mxu0 %v568_v21  ;;  %s684_s30 = scalar_lea.vmem %s503_s29, 128  ;;  %p689_p5 = scmp.lt.s32.totalorder %s503_s29, %s503_s29 }
  0x4e   :  { %v120_v11 = vsub.s32 5, %v84_v1  ;;  %v113_v12 = vsub.s32 4, %v84_v1  ;;  %v134_v15 = vsub.s32 7, %v84_v1  ;;  %v127_v16 = vsub.s32 6, %v84_v1  ;;  %570 = vmatprep.subr.bf16.mxu0 %v720_v22  ;;  %575 = vmatpush3.bf16.msra.mxu1 %v574_v29  ;;  %p685_p4 = scmp.ne.s32.totalorder %s503_s29, %s684_s30  ;;  %p690_p6 = scmp.lt.s32.totalorder %s684_s30, %s684_s30 }
  0x4f   :  { %v100_v7 = vrot.slane %v80_v6, %v99_v2  ;;  %v86_v8 = vrot.slane %v80_v6, %v85_v3  ;;  %v107_v9 = vrot.slane %v80_v6, %v106_v4  ;;  %v93_v10 = vrot.slane %v80_v6, %v92_v5  ;;  %576 = vmatprep.subr.bf16.mxu1 %v720_v22 }
  0x50   :  { %v121_v13 = vrot.slane %v80_v6, %v120_v11  ;;  %v114_v14 = vrot.slane %v80_v6, %v113_v12  ;;  %v135_v17 = vrot.slane %v80_v6, %v134_v15  ;;  %v128_v18 = vrot.slane %v80_v6, %v127_v16  ;;  %p691_p7 = por %p690_p6, %p689_p5 }
  0x51   :  { %102 = vbcast.lane.b32.xlu1 %v100_v7, 256  ;;  %88 = vbcast.lane.b32.xlu0 %v86_v8, 256  ;;  %vm245_vm13 = vcmask 1044484   ;;  %vm247_vm14 = vcmask 1045509   ;;  %vm249_vm15 = vcmask 1046534  }
  0x52   :  { %572 = vmatpush3.bf16.msra.mxu0 %v571_v25  ;;  %p692_p8 = pnand %p691_p7, %p685_p4 }
  0x53   :  { %579 = vmatprep.subr.bf16.mxu0 %v720_v22 }
  0x55   :  { %109 = vbcast.lane.b32.xlu1 %v107_v9, 256  ;;  %95 = vbcast.lane.b32.xlu0 %v93_v10, 256 }
  0x59   :  { %123 = vbcast.lane.b32.xlu1 %v121_v13, 256  ;;  %116 = vbcast.lane.b32.xlu0 %v114_v14, 256 }
  0x5d   :  { %137 = vbcast.lane.b32.xlu1 %v135_v17, 256  ;;  %130 = vbcast.lane.b32.xlu0 %v128_v18, 256 }
  0xc3   :  { %v103_v31 = vpop.permute.xlu1 %102  ;;  %v89_v32 = vpop.permute.xlu0 %88 }
  0xc4   :  { %vm141_vm2 = vcmp.eq.s32.totalorder %v103_v31, %v82_v30  ;;  %vm139_vm3 = vcmp.eq.s32.totalorder %v89_v32, %v82_v30 }
  0xc5   :  { %v149_v34 = vsel %vm141_vm2, 1, %v723_v33  ;;  %v147_v35 = vsel %vm139_vm3, 1, %v723_v33  ;;  %vm251_vm2 = vcmask 1047559  }
  0xc6   :  { %v170_v36 = vsel %vm155_vm1, %v149_v34, 0  ;;  %v156_v37 = vsel %vm155_vm1, %v147_v35, 0 }
  0xc7   :  { %v171_v38 = vrot.slane %v170_v36, 4  ;;  %v157_v39 = vrot.slane %v156_v37, 4  ;;  %v110_v40 = vpop.permute.xlu1 %109  ;;  %v96_v41 = vpop.permute.xlu0 %95 }
  0xc8   :  { %vm142_vm4 = vcmp.eq.s32.totalorder %v110_v40, %v82_v30  ;;  %vm140_vm5 = vcmp.eq.s32.totalorder %v96_v41, %v82_v30 }
  0xc9   :  { %v172_v42 = vadd.s32 %v171_v38, %v170_v36  ;;  %v158_v43 = vadd.s32 %v157_v39, %v156_v37  ;;  %v150_v44 = vsel %vm142_vm4, 1, %v723_v33  ;;  %v148_v45 = vsel %vm140_vm5, 1, %v723_v33 }
  0xca   :  { %v177_v46 = vsel %vm155_vm1, %v150_v44, 0  ;;  %v163_v47 = vsel %vm155_vm1, %v148_v45, 0 }
  0xcb   :  { %v173_v48 = vrot.slane %v172_v42, 2  ;;  %v159_v49 = vrot.slane %v158_v43, 2  ;;  %v178_v50 = vrot.slane %v177_v46, 4  ;;  %v164_v51 = vrot.slane %v163_v47, 4  ;;  %v124_v52 = vpop.permute.xlu1 %123  ;;  %v117_v53 = vpop.permute.xlu0 %116 }
  0xcc   :  { %vm144_vm6 = vcmp.eq.s32.totalorder %v124_v52, %v82_v30  ;;  %vm143_vm7 = vcmp.eq.s32.totalorder %v117_v53, %v82_v30 }
  0xcd   :  { %v174_v54 = vadd.s32 %v173_v48, %v172_v42  ;;  %v160_v55 = vadd.s32 %v159_v49, %v158_v43  ;;  %v179_v56 = vadd.s32 %v178_v50, %v177_v46  ;;  %v165_v57 = vadd.s32 %v164_v51, %v163_v47 }
  0xce   :  { %v152_v58 = vsel %vm144_vm6, 1, %v723_v33  ;;  %v151_v59 = vsel %vm143_vm7, 1, %v723_v33 }
  0xcf   :  { %v175_v60 = vrot.slane %v174_v54, 1  ;;  %v161_v61 = vrot.slane %v160_v55, 1  ;;  %v180_v62 = vrot.slane %v179_v56, 2  ;;  %v166_v63 = vrot.slane %v165_v57, 2  ;;  %v138_v0 = vpop.permute.xlu1 %137  ;;  %v131_v1 = vpop.permute.xlu0 %130 }
  0xd0   :  { %v191_v2 = vsel %vm155_vm1, %v152_v58, 0  ;;  %v184_v3 = vsel %vm155_vm1, %v151_v59, 0  ;;  %vm146_vm8 = vcmp.eq.s32.totalorder %v138_v0, %v82_v30  ;;  %vm145_vm9 = vcmp.eq.s32.totalorder %v131_v1, %v82_v30  ;;  %v329_v58 = vld [vmem:[#allocation7 + $0x18] sm:$0xff] }
  0xd1   :  { %v162_v4 = vadd.s32 %v161_v61, %v160_v55  ;;  %v181_v5 = vadd.s32 %v180_v62, %v179_v56  ;;  %v167_v6 = vadd.s32 %v166_v63, %v165_v57  ;;  %v192_v7 = vrot.slane %v191_v2, 4  ;;  %v328_v57 = vld [vmem:[#allocation7 + $0x10] sm:$0xff]  ;;  %v412_v61 = vld [vmem:[#allocation8 + $0x8] sm:$0xff]  ;;  %v513_v63 = vld [vmem:[%s868_s2] ss:$0 sm:$0xff] }
  0xd2   :  { %v185_v8 = vrot.slane %v184_v3, 4  ;;  %v154_v9 = vsel %vm146_vm8, 1, %v723_v33  ;;  %v153_v10 = vsel %vm145_vm9, 1, %v723_v33  ;;  %v176_v11 = vadd.s32 %v175_v60, %v174_v54  ;;  %v411_v60 = vld [vmem:[#allocation8] sm:$0xff] }
  0xd3   :  { %v182_v12 = vrot.slane %v181_v5, 1  ;;  %v168_v13 = vrot.slane %v167_v6, 1  ;;  %v193_v14 = vadd.s32 %v192_v7, %v191_v2  ;;  %v205_v16 = vsel %vm155_vm1, %v154_v9, 0 }
  0xd4   :  { %v186_v15 = vadd.s32 %v185_v8, %v184_v3  ;;  %v198_v17 = vsel %vm155_vm1, %v153_v10, 0  ;;  %v206_v19 = vrot.slane %v205_v16, 4  ;;  %v212_v21 = vcvt.s32.f32 %v162_v4  ;;  %v414_v4 = vld [vmem:[#allocation8 + $0x18] sm:$0xff] }
  0xd5   :  { %v169_v18 = vadd.s32 %v168_v13, %v167_v6  ;;  %v199_v20 = vrot.slane %v198_v17, 4  ;;  %v194_v23 = vrot.slane %v193_v14, 2  ;;  %v183_v25 = vadd.s32 %v182_v12, %v181_v5  ;;  %v515_v6 = vld [vmem:[%s870_s4] ss:$0 sm:$0xff] }
  0xd6   :  { %v187_v24 = vrot.slane %v186_v15, 2  ;;  %v207_v28 = vadd.s32 %v206_v19, %v205_v16  ;;  %v214_v30 = vcvt.s32.f32 %v176_v11  ;;  %v577_v59 = vpack.c.bf16 %v329_v58, %v328_v57  ;;  %v517_v10 = vld [vmem:[%s872_s6] ss:$0 sm:$0xff] }
  0xd7   :  { %v213_v27 = vcvt.s32.f32 %v169_v18  ;;  %v200_v29 = vadd.s32 %v199_v20, %v198_v17  ;;  %v195_v31 = vadd.s32 %v194_v23, %v193_v14  ;;  %v215_v39 = vcvt.s32.f32 %v183_v25 }
  0xd8   :  { %v188_v32 = vadd.s32 %v187_v24, %v186_v15  ;;  %v208_v34 = vrot.slane %v207_v28, 2  ;;  %578 = vmatpush3.bf16.msra.mxu1 %v577_v59  ;;  %v580_v62 = vpack.c.bf16 %v412_v61, %v411_v60 }
  0xd9   :  { %v240_v33 = vsel %vm239_vm10, %v213_v27, %v212_v21  ;;  %v201_v35 = vrot.slane %v200_v29, 2  ;;  %v196_v36 = vrot.slane %v195_v31, 1 }
  0xda   :  { %v189_v37 = vrot.slane %v188_v32, 1  ;;  %v242_v38 = vsel %vm241_vm11, %v214_v30, %v240_v33  ;;  %v209_v40 = vadd.s32 %v208_v34, %v207_v28 }
  0xdb   :  { %v202_v41 = vadd.s32 %v201_v35, %v200_v29  ;;  %v197_v42 = vadd.s32 %v196_v36, %v195_v31  ;;  %v244_v46 = vsel %vm243_vm12, %v215_v39, %v242_v38 }
  0xdc   :  { %v190_v43 = vadd.s32 %v189_v37, %v188_v32  ;;  %v210_v44 = vrot.slane %v209_v40, 1 }
  0xdd   :  { %v203_v45 = vrot.slane %v202_v41, 1  ;;  %v217_v47 = vcvt.s32.f32 %v197_v42 }
  0xde   :  { %v216_v48 = vcvt.s32.f32 %v190_v43  ;;  %v211_v49 = vadd.s32 %v210_v44, %v209_v40 }
  0xdf   :  { %v204_v50 = vadd.s32 %v203_v45, %v202_v41 }
  0xe0   :  { %v246_v51 = vsel %vm245_vm13, %v216_v48, %v244_v46  ;;  %v219_v53 = vcvt.s32.f32 %v211_v49 }
  0xe1   :  { %v218_v52 = vcvt.s32.f32 %v204_v50  ;;  %v248_v54 = vsel %vm247_vm14, %v217_v47, %v246_v51 }
  0xe3   :  { %v250_v55 = vsel %vm249_vm15, %v218_v52, %v248_v54 }
  0xe4   :  { %v252_v56 = vsel %vm251_vm2, %v219_v53, %v250_v55 }
  0xe5   :  { %543 = vmatmul.mubr.msk.f32.vlgmr.msra.gmra.mrb[0].mxu0 %vm155_vm1, %v252_v56 }
  0xe6   :  { %564 = vmatprep.mubr.msk.f32.mxu0 %vm721_vm0, %v722_v26  ;;  %581 = vmatpush3.bf16.msra.mxu0 %v580_v62  ;;  %v413_v26 = vld [vmem:[#allocation8 + $0x10] sm:$0xff] }
  0xe7   :  { %582 = vmatprep.subr.bf16.mxu0 %v720_v22  ;;  %v583_v5 = vpack.c.bf16 %v414_v4, %v413_v26 }
  0xea   :  { %584 = vmatpush3.bf16.msra.mxu0 %v583_v5 }
 0x1b8   :  { %v321_v0 = vpop.f32.mrb[0].mxu0 }
 0x1b9   :  { %v322_v1 = vadd.f32 %v513_v63, %v321_v0  ;;  %v544_v2 = vpop.f32.mrb[1].mxu0 }
 0x1bb   :  { %v325_v3 = vmax.f32 %v322_v1, 0.0 }
 0x1bd   :  { %554 = vmatmul.mubr.msk.f32.vlgmr.msra.gmra.mrb[0].mxu1 %vm155_vm1, %v325_v3 }
 0x290   :  { %v406_v7 = vpop.f32.mrb[0].mxu1 }
 0x291   :  { %v407_v22 = vadd.f32 %v515_v6, %v406_v7  ;;  %v555_v8 = vpop.f32.mrb[1].mxu1 }
 0x293   :  { %v410_v9 = vmax.f32 %v407_v22, 0.0 }
 0x295   :  { %565 = vmatmul.mubr.msk.f32.vlgmr.msra.gmra.mrb[2].mxu0 %vm155_vm1, %v410_v9 }
 0x368   :  { %v491_v11 = vpop.f32.mrb[2].mxu0 }
 0x369   :  { %v492_v12 = vadd.f32 %v517_v10, %v491_v11  ;;  %v566_v13 = vpop.f32.mrb[3].mxu0 }
 0x36b   :  { %495 = vst [vmem:[#allocation10] sm:$0xff] %v492_v12 }
 0x36c   :  { %695 = shalt.err (!%p692_p8)
}
 0x36d   :  { %s696_s9 = scalar_lea.hbm %s873_s7, 128 }
 0x36e   :  { %p697_p9 = scmp.ne.s32.totalorder %s873_s7, %s696_s9  ;;  %p700_p10 = scmp.lt.u32.totalorder %s696_s9, %s873_s7 }
 0x370   :  { %p702_p11 = pnand %p700_p10, %p697_p9 }
 0x372   :  { %705 = shalt.err (!%p702_p11)
}
 0x373   :  { %505 = dma.vmem_to_hbm [thread:$0]  %s503_s29, 128, %s873_s7, [#allocation4]  }
 0x374   :  { %712 = dma.done.wait [#allocation4], 128  }
 0x375   :  { %713 = vsyncadd [#allocation4], 4294967168 }
 0x376   :  { %509 = vsyncpa [#allocation3], 1 }
 0x377   :  { %510 = vsyncpa [#allocation6], 1 }
 0x378   :  { %511 = vsyncpa [#allocation9], 1 }
 0x379   :  { %512 = vsyncpa [#allocation4], 1 }

</bundles_post_ra>
